<compile_context>
chip_gen: v7x
topology: tpu7x:2x2x1
jax: 0.10.0
libtpu: 0.0.40
codegen_flags: <defaults>
</compile_context>

<pallas_src>
import functools

import jax
import jax.numpy as jnp
from jax.experimental import pallas as pl
from jax.experimental.pallas import tpu as pltpu

_LANE = 128          # TPU vreg lane width
_NEG_BIG = -1e30     # mask value for padded class columns (exp -> 0, max unaffected)


def _round_up(n, m):
    return (n + m - 1) // m * m


def _mlp_kernel(x_ref, w1_ref, b1_ref, w2_ref, b2_ref, w3_ref, b3_ref, o_ref):
    # fc1 + ReLU  (weights pre-transposed to (in, out) and lane-padded)
    h1 = jnp.dot(x_ref[...], w1_ref[...], preferred_element_type=jnp.float32)
    h1 = jnp.maximum(h1 + b1_ref[...], 0.0)

    # fc2 + ReLU  (padded hidden columns stay exactly 0: zero weights/bias, ReLU(0)=0)
    h2 = jnp.dot(h1, w2_ref[...], preferred_element_type=jnp.float32)
    h2 = jnp.maximum(h2 + b2_ref[...], 0.0)

    # output layer; padded class columns get a ~-1e30 bias so they never win the
    # max and contribute exp(...) == 0 to the softmax denominator.
    logits = jnp.dot(h2, w3_ref[...], preferred_element_type=jnp.float32) + b3_ref[...]

    # log_softmax over the class axis (last axis) with max-shift.
    m = jnp.max(logits, axis=-1, keepdims=True)
    shifted = logits - m
    lse = jnp.log(jnp.sum(jnp.exp(shifted), axis=-1, keepdims=True))
    o_ref[...] = (shifted - lse).astype(o_ref.dtype)


def prepare_params(w1, b1, w2, b2, w3, b3):
    """One-time parameter prep (call at init, NOT per forward call).

    Takes PyTorch nn.Linear layout weights (out, in) / biases (out,), returns
    (in, out) weights zero-padded on the lane (output-feature) axis to multiples
    of 128, and (1, out_pad) biases.  Padded class-bias entries are -1e30.
    """
    in_size = w1.shape[1]
    h1, h2, c = w1.shape[0], w2.shape[0], w3.shape[0]
    h1p, h2p, cp = _round_up(h1, _LANE), _round_up(h2, _LANE), _round_up(c, _LANE)

    f32 = jnp.float32
    w1p = jnp.zeros((in_size, h1p), f32).at[:, :h1].set(w1.T.astype(f32))
    b1p = jnp.zeros((1, h1p), f32).at[:, :h1].set(b1.astype(f32))
    w2p = jnp.zeros((h1p, h2p), f32).at[:h1, :h2].set(w2.T.astype(f32))
    b2p = jnp.zeros((1, h2p), f32).at[:, :h2].set(b2.astype(f32))
    w3p = jnp.zeros((h2p, cp), f32).at[:h2, :c].set(w3.T.astype(f32))
    b3p = jnp.full((1, cp), _NEG_BIG, f32).at[:, :c].set(b3.astype(f32))
    return (w1p, b1p, w2p, b2p, w3p, b3p), c


@functools.partial(jax.jit, static_argnames=("num_classes", "block_b"))
def mlp_forward(x, params, num_classes, block_b=128):
    """x: [B, input_size] float32.  params: output of prepare_params."""
    w1p, b1p, w2p, b2p, w3p, b3p = params
    B, in_size = x.shape
    h1p, h2p, cp = w1p.shape[1], w2p.shape[1], w3p.shape[1]

    # Row tile: multiple of 8 (f32 sublane), capped by the (padded) batch.
    tb = min(block_b, _round_up(B, 8))
    b_pad = _round_up(B, tb)
    if b_pad != B:
        x = jnp.pad(x, ((0, b_pad - B), (0, 0)))
    grid = (b_pad // tb,)

    # VMEM budget: double-buffered x/out tiles + resident weights + live activations.
    tile_bytes = 4 * tb * (in_size + cp)
    weight_bytes = 4 * (in_size * h1p + h1p * h2p + h2p * cp + h1p + h2p + cp)
    live_bytes = 4 * tb * (h1p + h2p + cp)
    vmem_limit = 2 * (2 * tile_bytes + 2 * weight_bytes + live_bytes)  # 2x headroom
    vmem_limit = int(min(max(vmem_limit, 4 << 20), 64 << 20))

    cost = pl.CostEstimate(
        flops=2 * b_pad * (in_size * h1p + h1p * h2p + h2p * cp),
        transcendentals=b_pad * cp,
        bytes_accessed=4 * (b_pad * in_size + b_pad * cp) + weight_bytes,
    )

    resident = lambda i: (0, 0)   # weights/biases: same block every grid step
    out_pad = pl.pallas_call(
        _mlp_kernel,
        out_shape=jax.ShapeDtypeStruct((b_pad, cp), jnp.float32),
        grid=grid,
        in_specs=[
            pl.BlockSpec((tb, in_size), lambda i: (i, 0)),   # x row tile
            pl.BlockSpec((in_size, h1p), resident),          # W1
            pl.BlockSpec((1, h1p), resident),                # b1
            pl.BlockSpec((h1p, h2p), resident),              # W2
            pl.BlockSpec((1, h2p), resident),                # b2
            pl.BlockSpec((h2p, cp), resident),               # W3
            pl.BlockSpec((1, cp), resident),                 # b3
        ],
        out_specs=pl.BlockSpec((tb, cp), lambda i: (i, 0)),  # lane-dense output
        compiler_params=pltpu.CompilerParams(
            dimension_semantics=("parallel",),
            vmem_limit_bytes=vmem_limit,
        ),
        cost_estimate=cost,
    )(x, w1p, b1p, w2p, b2p, w3p, b3p)

    # Strip row padding and the padded class lanes.
    return out_pad[:B, :num_classes]


def _ref_forward(x, w1, b1, w2, b2, w3, b3):
    h1 = jax.nn.relu(x @ w1.T + b1)
    h2 = jax.nn.relu(h1 @ w2.T + b2)
    return jax.nn.log_softmax(h2 @ w3.T + b3, axis=1)


if __name__ == "__main__":
    # Small shapes consistent with the module: input_size=64, hidden=(32, 32),
    # num_of_classes=10; batch=256 so the row grid actually pipelines (TB=128).
    B, IN, H1, H2, C = 256, 64, 32, 32, 10

    key = jax.random.PRNGKey(0)
    kx, k1, k2, k3, kb1, kb2, kb3 = jax.random.split(key, 7)

    x = jax.random.normal(kx, (B, IN), dtype=jnp.float32)

    # Deterministic synthetic parameters (PyTorch Linear layout: (out, in)).
    w1 = jax.random.normal(k1, (H1, IN), dtype=jnp.float32) * 0.1
    b1 = jax.random.normal(kb1, (H1,), dtype=jnp.float32) * 0.1
    w2 = jax.random.normal(k2, (H2, H1), dtype=jnp.float32) * 0.1
    b2 = jax.random.normal(kb2, (H2,), dtype=jnp.float32) * 0.1
    w3 = jax.random.normal(k3, (C, H2), dtype=jnp.float32) * 0.1
    b3 = jax.random.normal(kb3, (C,), dtype=jnp.float32) * 0.1

    # One-time prep: transpose + lane-pad weights (kept out of the per-call path).
    params, num_classes = prepare_params(w1, b1, w2, b2, w3, b3)
    params = jax.block_until_ready(params)

    out = mlp_forward(x, params, num_classes)
    out = jax.block_until_ready(out)

    ref = _ref_forward(x, w1, b1, w2, b2, w3, b3)
    assert out.shape == (B, C)
    assert jnp.allclose(out, ref, atol=1e-5, rtol=1e-5), "mismatch vs JAX reference"

    print("KERNEL_OK")
</pallas_src>

<mosaic_0001>
module attributes {stable_mosaic.version = 11 : i64} {
  func.func @_mlp_kernel(%arg0: i32, %arg1: memref<128x64xf32, #tpu.memory_space<vmem>>, %arg2: memref<64x128xf32, #tpu.memory_space<vmem>>, %arg3: memref<1x128xf32, #tpu.memory_space<vmem>>, %arg4: memref<128x128xf32, #tpu.memory_space<vmem>>, %arg5: memref<1x128xf32, #tpu.memory_space<vmem>>, %arg6: memref<128x128xf32, #tpu.memory_space<vmem>>, %arg7: memref<1x128xf32, #tpu.memory_space<vmem>>, %arg8: memref<128x128xf32, #tpu.memory_space<vmem>>) attributes {dimension_semantics = [#tpu.dimension_semantics<parallel>], iteration_bounds = array<i64: 2>, scalar_prefetch = 0 : i64, scratch_operands = 0 : i64, tpu.core_type = #tpu.core_type<tc>, window_params = [{transform_indices = @transform_0, window_bounds = array<i64: 128, 64>}, {pipeline_mode = #tpu.pipeline_mode<synchronous>, transform_indices = @transform_1, window_bounds = array<i64: 64, 128>}, {pipeline_mode = #tpu.pipeline_mode<synchronous>, transform_indices = @transform_2, window_bounds = array<i64: 1, 128>}, {pipeline_mode = #tpu.pipeline_mode<synchronous>, transform_indices = @transform_3, window_bounds = array<i64: 128, 128>}, {pipeline_mode = #tpu.pipeline_mode<synchronous>, transform_indices = @transform_4, window_bounds = array<i64: 1, 128>}, {pipeline_mode = #tpu.pipeline_mode<synchronous>, transform_indices = @transform_5, window_bounds = array<i64: 128, 128>}, {pipeline_mode = #tpu.pipeline_mode<synchronous>, transform_indices = @transform_6, window_bounds = array<i64: 1, 128>}, {transform_indices = @transform_7, window_bounds = array<i64: 128, 128>}]} {
    %c0 = arith.constant 0 : index
    %c0_0 = arith.constant 0 : index
    %0 = vector.load %arg1[%c0, %c0_0] : memref<128x64xf32, #tpu.memory_space<vmem>>, vector<128x64xf32>
    %c0_1 = arith.constant 0 : index
    %c0_2 = arith.constant 0 : index
    %1 = vector.load %arg2[%c0_1, %c0_2] : memref<64x128xf32, #tpu.memory_space<vmem>>, vector<64x128xf32>
    %cst = arith.constant dense<0.000000e+00> : vector<128x128xf32>
    %2 = tpu.matmul %0, %1, %cst {dimension_numbers = #tpu.dot_dimension_numbers<[1], [0], [0], [1], [0, 0, 1, 1], [], []>} : vector<128x64xf32>, vector<64x128xf32>, vector<128x128xf32> -> vector<128x128xf32>
    %c0_3 = arith.constant 0 : index
    %c0_4 = arith.constant 0 : index
    %3 = vector.load %arg3[%c0_3, %c0_4] : memref<1x128xf32, #tpu.memory_space<vmem>>, vector<1x128xf32>
    %4 = vector.broadcast %3 : vector<1x128xf32> to vector<128x128xf32>
    %5 = arith.addf %2, %4 : vector<128x128xf32>
    %cst_5 = arith.constant 0.000000e+00 : f32
    %6 = vector.broadcast %cst_5 : f32 to vector<128x128xf32>
    %7 = arith.maximumf %5, %6 : vector<128x128xf32>
    %c0_6 = arith.constant 0 : index
    %c0_7 = arith.constant 0 : index
    %8 = vector.load %arg4[%c0_6, %c0_7] : memref<128x128xf32, #tpu.memory_space<vmem>>, vector<128x128xf32>
    %cst_8 = arith.constant dense<0.000000e+00> : vector<128x128xf32>
    %9 = tpu.matmul %7, %8, %cst_8 {dimension_numbers = #tpu.dot_dimension_numbers<[1], [0], [0], [1], [0, 0, 1, 1], [], []>} : vector<128x128xf32>, vector<128x128xf32>, vector<128x128xf32> -> vector<128x128xf32>
    %c0_9 = arith.constant 0 : index
    %c0_10 = arith.constant 0 : index
    %10 = vector.load %arg5[%c0_9, %c0_10] : memref<1x128xf32, #tpu.memory_space<vmem>>, vector<1x128xf32>
    %11 = vector.broadcast %10 : vector<1x128xf32> to vector<128x128xf32>
    %12 = arith.addf %9, %11 : vector<128x128xf32>
    %cst_11 = arith.constant 0.000000e+00 : f32
    %13 = vector.broadcast %cst_11 : f32 to vector<128x128xf32>
    %14 = arith.maximumf %12, %13 : vector<128x128xf32>
    %c0_12 = arith.constant 0 : index
    %c0_13 = arith.constant 0 : index
    %15 = vector.load %arg6[%c0_12, %c0_13] : memref<128x128xf32, #tpu.memory_space<vmem>>, vector<128x128xf32>
    %cst_14 = arith.constant dense<0.000000e+00> : vector<128x128xf32>
    %16 = tpu.matmul %14, %15, %cst_14 {dimension_numbers = #tpu.dot_dimension_numbers<[1], [0], [0], [1], [0, 0, 1, 1], [], []>} : vector<128x128xf32>, vector<128x128xf32>, vector<128x128xf32> -> vector<128x128xf32>
    %c0_15 = arith.constant 0 : index
    %c0_16 = arith.constant 0 : index
    %17 = vector.load %arg7[%c0_15, %c0_16] : memref<1x128xf32, #tpu.memory_space<vmem>>, vector<1x128xf32>
    %18 = vector.broadcast %17 : vector<1x128xf32> to vector<128x128xf32>
    %19 = arith.addf %16, %18 : vector<128x128xf32>
    %cst_17 = arith.constant dense<0xFF800000> : vector<128xf32>
    %20 = vector.multi_reduction <maximumf>, %19, %cst_17 [1] : vector<128x128xf32> to vector<128xf32>
    %21 = vector.shape_cast %20 : vector<128xf32> to vector<128x1xf32>
    %22 = vector.broadcast %21 : vector<128x1xf32> to vector<128x128xf32>
    %23 = arith.subf %19, %22 : vector<128x128xf32>
    %24 = math.exp %23 : vector<128x128xf32>
    %cst_18 = arith.constant dense<0.000000e+00> : vector<128xf32>
    %25 = vector.multi_reduction <add>, %24, %cst_18 [1] : vector<128x128xf32> to vector<128xf32>
    %26 = vector.shape_cast %25 : vector<128xf32> to vector<128x1xf32>
    %27 = math.log %26 : vector<128x1xf32>
    %28 = vector.broadcast %27 : vector<128x1xf32> to vector<128x128xf32>
    %29 = arith.subf %23, %28 : vector<128x128xf32>
    %c0_19 = arith.constant 0 : index
    %c0_20 = arith.constant 0 : index
    %30 = vector.load %arg8[%c0_19, %c0_20] : memref<128x128xf32, #tpu.memory_space<vmem>>, vector<128x128xf32>
    tpu.vector_store %arg8[%c0_19, %c0_20], %29 {strides = array<i32>} : memref<128x128xf32, #tpu.memory_space<vmem>>, vector<128x128xf32>,
    return
  }
  func.func @transform_0(%arg0: i32) -> (i32, i32) {
    %c0_i32 = arith.constant 0 : i32
    %c0_i32_0 = arith.constant 0 : i32
    return %arg0, %c0_i32 : i32, i32
  }
  func.func @transform_1(%arg0: i32) -> (i32, i32) {
    %c0_i32 = arith.constant 0 : i32
    %c0_i32_0 = arith.constant 0 : i32
    %c0_i32_1 = arith.constant 0 : i32
    return %c0_i32, %c0_i32_0 : i32, i32
  }
  func.func @transform_2(%arg0: i32) -> (i32, i32) {
    %c0_i32 = arith.constant 0 : i32
    %c0_i32_0 = arith.constant 0 : i32
    %c0_i32_1 = arith.constant 0 : i32
    return %c0_i32, %c0_i32_0 : i32, i32
  }
  func.func @transform_3(%arg0: i32) -> (i32, i32) {
    %c0_i32 = arith.constant 0 : i32
    %c0_i32_0 = arith.constant 0 : i32
    %c0_i32_1 = arith.constant 0 : i32
    return %c0_i32, %c0_i32_0 : i32, i32
  }
  func.func @transform_4(%arg0: i32) -> (i32, i32) {
    %c0_i32 = arith.constant 0 : i32
    %c0_i32_0 = arith.constant 0 : i32
    %c0_i32_1 = arith.constant 0 : i32
    return %c0_i32, %c0_i32_0 : i32, i32
  }
  func.func @transform_5(%arg0: i32) -> (i32, i32) {
    %c0_i32 = arith.constant 0 : i32
    %c0_i32_0 = arith.constant 0 : i32
    %c0_i32_1 = arith.constant 0 : i32
    return %c0_i32, %c0_i32_0 : i32, i32
  }
  func.func @transform_6(%arg0: i32) -> (i32, i32) {
    %c0_i32 = arith.constant 0 : i32
    %c0_i32_0 = arith.constant 0 : i32
    %c0_i32_1 = arith.constant 0 : i32
    return %c0_i32, %c0_i32_0 : i32, i32
  }
  func.func @transform_7(%arg0: i32) -> (i32, i32) {
    %c0_i32 = arith.constant 0 : i32
    %c0_i32_0 = arith.constant 0 : i32
    return %arg0, %c0_i32 : i32, i32
  }
}

</mosaic_0001>

<bundles_post_ra>
// kernel: mlp_forward.1
= control target key start
LH: loop header
LB: loop body
LE: loop exit
PB: predicated region body
PF: predicated region fallthrough
CT: control target
= control target key end

     0   :  { %s1593_s24 = smov 0   ;;  %s1920_s0 = inlined_call_operand.vmem [shape: f32[256,64], index: 0, kind: input, shape index: {}]   ;;  %s1921_s1 = inlined_call_operand.vmem [shape: f32[64,128], index: 1, kind: input, shape index: {}]   ;;  %s1922_s2 = inlined_call_operand.vmem [shape: f32[1,128], index: 2, kind: input, shape index: {}]   ;;  %s1923_s3 = inlined_call_operand.vmem [shape: f32[128,128], index: 3, kind: input, shape index: {}]   ;;  %s1924_s4 = inlined_call_operand.vmem [shape: f32[1,128], index: 4, kind: input, shape index: {}]   ;;  %s1925_s5 = inlined_call_operand.vmem [shape: f32[128,128], index: 5, kind: input, shape index: {}]   ;;  %s1926_s6 = inlined_call_operand.vmem [shape: f32[1,128], index: 6, kind: input, shape index: {}]   ;;  %s1927_s7 = inlined_call_operand.vmem [shape: f32[256,128], index: 7, kind: output, shape index: {}]  }
   0x1 LB: > { %s1107_s25 = sadd.s32 4294967295, %s1551_s24   ;;  %p1111_p0 = scmp.ge.s32.totalorder %s1551_s24, 1  ;;  %s1551_s24 = sphi %s1593_s24, %s17_s24  }
   0x2   : > { %p238_p1 = scmp.lt.s32.totalorder %s1551_s24, 3 }
   0x4   : > { %p239_p2 = pnand %p1111_p0, %p238_p1 }
   0x5   : > { %v298_v0 = vld [vmem:[%s1921_s1] sm:$0xff] (!%p239_p2)  ;;  %v299_v1 = vld [vmem:[%s1921_s1 + $0x8] sm:$0xff] (!%p239_p2)  ;;  %v300_v2 = vld [vmem:[%s1921_s1 + $0x10] sm:$0xff] (!%p239_p2)  ;;  %s1112_s9 = sshll.u32 (!%p239_p2), %s1107_s25, 4  ;;  %vm313_vm0 = vcmask (!%p239_p2), 523264  }
   0x6   : > { %242 = sbr.rel (%p239_p2) target bundleno = 1022 (0x3fe), region = 48  ;;  %v1377_v3 = vpack.c.bf16 (!%p239_p2), %v299_v1, %v298_v0  ;;  %v301_v4 = vld [vmem:[%s1921_s1 + $0x18] sm:$0xff] (!%p239_p2)  ;;  %p271_p3 = scmp.lt.s32.totalorder (!%p239_p2), %s1112_s9, 31  ;;  %v302_v6 = vld [vmem:[%s1921_s1 + $0x20] sm:$0xff] (!%p239_p2)  ;;  %v303_v7 = vld [vmem:[%s1921_s1 + $0x28] sm:$0xff] (!%p239_p2) }
   0x7   : > { %v1381_v5 = vpack.c.bf16 (!%p239_p2), %v301_v4, %v300_v2  ;;  %v523_v8 = vld [vmem:[%s1923_s3] sm:$0xff] (!%p239_p2)  ;;  %v524_v9 = vld [vmem:[%s1923_s3 + $0x8] sm:$0xff] (!%p239_p2)  ;;  %v525_v10 = vld [vmem:[%s1923_s3 + $0x10] sm:$0xff] (!%p239_p2)  ;;  %v1385_v13 = vpack.c.bf16 (!%p239_p2), %v303_v7, %v302_v6 }
   0x8   : > { %1378 = vmatprep.subr.bf16.mxu0 (!%p239_p2), %v1377_v3  ;;  %v526_v11 = vld [vmem:[%s1923_s3 + $0x18] sm:$0xff] (!%p239_p2)  ;;  %v1393_v12 = vpack.c.bf16 (!%p239_p2), %v524_v9, %v523_v8  ;;  %v527_v15 = vld [vmem:[%s1923_s3 + $0x20] sm:$0xff] (!%p239_p2)  ;;  %v528_v16 = vld [vmem:[%s1923_s3 + $0x28] sm:$0xff] (!%p239_p2) }
   0x9   : > { %1380 = vmatpush3.bf16.msra.mxu0 (!%p239_p2), %v1377_v3  ;;  %v1397_v14 = vpack.c.bf16 (!%p239_p2), %v526_v11, %v525_v10  ;;  %v304_v17 = vld [vmem:[%s1921_s1 + $0x30] sm:$0xff] (!%p239_p2)  ;;  %v305_v18 = vld [vmem:[%s1921_s1 + $0x38] sm:$0xff] (!%p239_p2)  ;;  %v1401_v20 = vpack.c.bf16 (!%p239_p2), %v528_v16, %v527_v15  ;;  %v531_v25 = vld [vmem:[%s1923_s3 + $0x40] sm:$0xff] (!%p239_p2) }
   0xa   : > { %1382 = vmatprep.subr.bf16.mxu0 (!%p239_p2), %v1381_v5  ;;  %1394 = vmatprep.subr.bf16.mxu1 (!%p239_p2), %v1393_v12  ;;  %v1389_v21 = vpack.c.bf16 (!%p239_p2), %v305_v18, %v304_v17  ;;  %v529_v22 = vld [vmem:[%s1923_s3 + $0x30] sm:$0xff] (!%p239_p2)  ;;  %v530_v23 = vld [vmem:[%s1923_s3 + $0x38] sm:$0xff] (!%p239_p2)  ;;  %v532_v26 = vld [vmem:[%s1923_s3 + $0x48] sm:$0xff] (!%p239_p2) }
   0xb   : > { %1396 = vmatpush3.bf16.msra.mxu1 (!%p239_p2), %v1393_v12  ;;  %v1405_v24 = vpack.c.bf16 (!%p239_p2), %v530_v23, %v529_v22  ;;  %v1409_v28 = vpack.c.bf16 (!%p239_p2), %v532_v26, %v531_v25  ;;  %v533_v30 = vld [vmem:[%s1923_s3 + $0x50] sm:$0xff] (!%p239_p2)  ;;  %v534_v31 = vld [vmem:[%s1923_s3 + $0x58] sm:$0xff] (!%p239_p2)  ;;  %v535_v35 = vld [vmem:[%s1923_s3 + $0x60] sm:$0xff] (!%p239_p2) }
   0xc   : > { %1398 = vmatprep.subr.bf16.mxu1 (!%p239_p2), %v1397_v14  ;;  %v1413_v33 = vpack.c.bf16 (!%p239_p2), %v534_v31, %v533_v30  ;;  %v536_v36 = vld [vmem:[%s1923_s3 + $0x68] sm:$0xff] (!%p239_p2)  ;;  %v537_v49 = vld [vmem:[%s1923_s3 + $0x70] sm:$0xff] (!%p239_p2)  ;;  %v538_v50 = vld [vmem:[%s1923_s3 + $0x78] sm:$0xff] (!%p239_p2) }
   0xd   : > { %s1929_s9 = smov (!%p271_p3, %s1112_s9), 31  ;;  %1384 = vmatpush3.bf16.msra.mxu0 %v1381_v5  ;;  %v1417_v38 = vpack.c.bf16 %v536_v36, %v535_v35  ;;  %v1421_v51 = vpack.c.bf16 %v538_v50, %v537_v49  ;;  %v707_v52 = vld [vmem:[%s1925_s5] sm:$0xff]  ;;  %v708_v53 = vld [vmem:[%s1925_s5 + $0x8] sm:$0xff]  ;;  %v709_v54 = vld [vmem:[%s1925_s5 + $0x10] sm:$0xff] }
   0xe   : > { %s1113_s25 = sshll.u32 %s1929_s9, 3  ;;  %1386 = vmatprep.subr.bf16.mxu0 %v1385_v13  ;;  %v1425_v55 = vpack.c.bf16 %v708_v53, %v707_v52  ;;  %v710_v56 = vld [vmem:[%s1925_s5 + $0x18] sm:$0xff]  ;;  %v711_v58 = vld [vmem:[%s1925_s5 + $0x20] sm:$0xff]  ;;  %v712_v59 = vld [vmem:[%s1925_s5 + $0x28] sm:$0xff] }
   0xf   : > { %s1651_s14 = scalar_lea.vmem %s1920_s0, %s1113_s25  ;;  %1400 = vmatpush3.bf16.msra.mxu1 %v1397_v14  ;;  %v1429_v57 = vpack.c.bf16 %v710_v56, %v709_v54  ;;  %v1433_v60 = vpack.c.bf16 %v712_v59, %v711_v58  ;;  %v713_v61 = vld [vmem:[%s1925_s5 + $0x30] sm:$0xff]  ;;  %v714_v62 = vld [vmem:[%s1925_s5 + $0x38] sm:$0xff]  ;;  %v715_v0 = vld [vmem:[%s1925_s5 + $0x40] sm:$0xff]  ;;  %s1883_s16 = scalar_lea.vmem %s1927_s7, %s1113_s25 }
  0x10   : > { %v282_v19 = vld [vmem:[%s1651_s14] sm:$0xff]  ;;  %1402 = vmatprep.subr.bf16.mxu1 %v1401_v20  ;;  %v283_v27 = vld [vmem:[%s1651_s14 + $0x8] sm:$0xff]  ;;  %v284_v29 = vld [vmem:[%s1651_s14 + $0x10] sm:$0xff]  ;;  %v1739_v63 = vpack.c.bf16 %v714_v62, %v713_v61 }
  0x11   : > { %1241 = vmatprep.mubr.msk.f32.mxu0 %vm313_vm0, %v282_v19  ;;  %1388 = vmatpush3.bf16.msra.mxu0 %v1385_v13  ;;  %v285_v32 = vld [vmem:[%s1651_s14 + $0x18] sm:$0xff]  ;;  %v286_v34 = vld [vmem:[%s1651_s14 + $0x20] sm:$0xff]  ;;  %v287_v37 = vld [vmem:[%s1651_s14 + $0x28] sm:$0xff] }
  0x12   : > { %1390 = vmatprep.subr.bf16.mxu0 %v1389_v21  ;;  %v288_v39 = vld [vmem:[%s1651_s14 + $0x30] sm:$0xff]  ;;  %v289_v40 = vld [vmem:[%s1651_s14 + $0x38] sm:$0xff]  ;;  %v290_v41 = vld [vmem:[%s1651_s14 + $0x40] sm:$0xff] }
  0x13   : > { %1404 = vmatpush3.bf16.msra.mxu1 %v1401_v20  ;;  %v291_v42 = vld [vmem:[%s1651_s14 + $0x48] sm:$0xff]  ;;  %v292_v43 = vld [vmem:[%s1651_s14 + $0x50] sm:$0xff]  ;;  %v293_v44 = vld [vmem:[%s1651_s14 + $0x58] sm:$0xff] }
  0x14   : > { %1406 = vmatprep.subr.bf16.mxu1 %v1405_v24  ;;  %v294_v45 = vld [vmem:[%s1651_s14 + $0x60] sm:$0xff]  ;;  %v295_v46 = vld [vmem:[%s1651_s14 + $0x68] sm:$0xff]  ;;  %v296_v47 = vld [vmem:[%s1651_s14 + $0x70] sm:$0xff] }
  0x15   : > { %1392 = vmatpush3.bf16.msra.mxu0 %v1389_v21  ;;  %v297_v48 = vld [vmem:[%s1651_s14 + $0x78] sm:$0xff]  ;;  %v716_v1 = vld [vmem:[%s1925_s5 + $0x48] sm:$0xff]  ;;  %v717_v3 = vld [vmem:[%s1925_s5 + $0x50] sm:$0xff] }
  0x16   : > { %1426 = vmatprep.subr.bf16.mxu0 %v1425_v55  ;;  %v1748_v2 = vpack.c.bf16 %v716_v1, %v715_v0  ;;  %v718_v4 = vld [vmem:[%s1925_s5 + $0x58] sm:$0xff]  ;;  %v719_v6 = vld [vmem:[%s1925_s5 + $0x60] sm:$0xff]  ;;  %v720_v7 = vld [vmem:[%s1925_s5 + $0x68] sm:$0xff] }
  0x17   : > { %1408 = vmatpush3.bf16.msra.mxu1 %v1405_v24  ;;  %v1758_v5 = vpack.c.bf16 %v718_v4, %v717_v3  ;;  %v1768_v8 = vpack.c.bf16 %v720_v7, %v719_v6  ;;  %v1776_v9 = vld [vmem:[%s1922_s2] ss:$0 sm:$0xff]  ;;  %v721_v58 = vld [vmem:[%s1925_s5 + $0x70] sm:$0xff]  ;;  %v722_v59 = vld [vmem:[%s1925_s5 + $0x78] sm:$0xff] }
  0x18   : > { %1242 = vmatmul.mubr.msk.f32.vlgmr.msra.gmra.mrb[0].mxu0 %vm313_vm0, %v283_v27  ;;  %1410 = vmatprep.subr.bf16.mxu1 %v1409_v28  ;;  %v1133_v61 = vld [vmem:[%s1924_s4] ss:$0 sm:$0xff] }
  0x19   : > { %1244 = vmatprep.mubr.msk.f32.mxu0 %vm313_vm0, %v284_v29  ;;  %1428 = vmatpush3.bf16.msra.mxu0 %v1425_v55 }
  0x1a   : > { %1430 = vmatprep.subr.bf16.mxu0 %v1429_v57 }
  0x1b   : > { %1412 = vmatpush3.bf16.msra.mxu1 %v1409_v28 }
  0x1c   : > { %1245 = vmatmul.mubr.msk.f32.gmra.mrb[2].mxu0 %vm313_vm0, %v285_v32  ;;  %1414 = vmatprep.subr.bf16.mxu1 %v1413_v33 }
  0x1d   : > { %1247 = vmatprep.mubr.msk.f32.mxu0 %vm313_vm0, %v286_v34  ;;  %1432 = vmatpush3.bf16.msra.mxu0 %v1429_v57 }
  0x1e   : > { %1434 = vmatprep.subr.bf16.mxu0 %v1433_v60 }
  0x1f   : > { %1416 = vmatpush3.bf16.msra.mxu1 %v1413_v33 }
  0x20   : > { %1248 = vmatmul.mubr.msk.f32.gmra.mrb[4].mxu0 %vm313_vm0, %v287_v37  ;;  %1418 = vmatprep.subr.bf16.mxu1 %v1417_v38 }
  0x21   : > { %1250 = vmatprep.mubr.msk.f32.mxu0 %vm313_vm0, %v288_v39  ;;  %1436 = vmatpush3.bf16.msra.mxu0 %v1433_v60 }
  0x22   : > { %1438 = vmatprep.subr.bf16.mxu0 %v1739_v63 }
  0x23   : > { %1420 = vmatpush3.bf16.msra.mxu1 %v1417_v38 }
  0x24   : > { %1251 = vmatmul.mubr.msk.f32.gmra.mrb[6].mxu0 %vm313_vm0, %v289_v40  ;;  %1422 = vmatprep.subr.bf16.mxu1 %v1421_v51 }
  0x25   : > { %1253 = vmatprep.mubr.msk.f32.mxu0 %vm313_vm0, %v290_v41  ;;  %1440 = vmatpush3.bf16.msra.mxu0 %v1739_v63 }
  0x26   : > { %1442 = vmatprep.subr.bf16.mxu0 %v1748_v2 }
  0x27   : > { %1424 = vmatpush3.bf16.msra.mxu1 %v1421_v51 }
  0x28   : > { %1254 = vmatmul.mubr.msk.f32.gmra.mrb[8].mxu0 %vm313_vm0, %v291_v42  ;;  %1457 = vmatprep.subr.bf16.mxu1 %v1425_v55 }
  0x29   : > { %1256 = vmatprep.mubr.msk.f32.mxu0 %vm313_vm0, %v292_v43  ;;  %1444 = vmatpush3.bf16.msra.mxu0 %v1748_v2 }
  0x2a   : > { %1446 = vmatprep.subr.bf16.mxu0 %v1758_v5 }
  0x2c   : > { %1257 = vmatmul.mubr.msk.f32.gmra.mrb[10].mxu0 %vm313_vm0, %v293_v44 }
  0x2d   : > { %1259 = vmatprep.mubr.msk.f32.mxu0 %vm313_vm0, %v294_v45  ;;  %1448 = vmatpush3.bf16.msra.mxu0 %v1758_v5 }
  0x2e   : > { %1450 = vmatprep.subr.bf16.mxu0 %v1768_v8 }
  0x30   : > { %1260 = vmatmul.mubr.msk.f32.gmra.mrb[12].mxu0 %vm313_vm0, %v295_v46 }
  0x31   : > { %1262 = vmatprep.mubr.msk.f32.mxu0 %vm313_vm0, %v296_v47  ;;  %1452 = vmatpush3.bf16.msra.mxu0 %v1768_v8 }
  0x34   : > { %1263 = vmatmul.mubr.msk.f32.gmra.mrb[14].mxu0 %vm313_vm0, %v297_v48 }
  0xeb   : > { %v1243_v10 = vpop.f32.mrb[0].mxu0 }
  0xec   : > { %v434_v11 = vadd.f32 %v1243_v10, %v1776_v9  ;;  %v428_v12 = vpop.f32.mrb[1].mxu0 }
  0xed   : > { %v429_v13 = vadd.f32 %v1776_v9, %v428_v12 }
  0xee   : > { %v508_v16 = vmax.f32 %v434_v11, 0.0 }
  0xef   : > { %v1246_v14 = vpop.f32.mrb[2].mxu0  ;;  %v507_v15 = vmax.f32 %v429_v13, 0.0 }
  0xf0   : > { %v444_v17 = vadd.f32 %v1246_v14, %v1776_v9  ;;  %v438_v18 = vpop.f32.mrb[3].mxu0 }
  0xf1   : > { %v439_v19 = vadd.f32 %v1776_v9, %v438_v18  ;;  %1297 = vmatprep.mubr.f32.mxu1 %v507_v15 }
  0xf2   : > { %1298 = vmatmul.mubr.f32.vlgmr.msra.gmra.mrb[0].mxu1 %v508_v16  ;;  %v510_v22 = vmax.f32 %v444_v17, 0.0 }
  0xf3   : > { %v509_v20 = vmax.f32 %v439_v19, 0.0  ;;  %v1249_v21 = vpop.f32.mrb[4].mxu0  ;;  %1465 = vmatpush3.bf16.msra.mxu1 %v1425_v55 }
  0xf4   : > { %v454_v23 = vadd.f32 %v1249_v21, %v1776_v9  ;;  %v448_v24 = vpop.f32.mrb[5].mxu0  ;;  %1458 = vmatprep.subr.bf16.mxu1 %v1429_v57 }
  0xf5   : > { %v449_v25 = vadd.f32 %v1776_v9, %v448_v24  ;;  %1300 = vmatprep.mubr.f32.mxu1 %v509_v20 }
  0xf6   : > { %v512_v26 = vmax.f32 %v454_v23, 0.0  ;;  %1301 = vmatmul.mubr.f32.gmra.mrb[2].mxu1 %v510_v22 }
  0xf7   : > { %v511_v27 = vmax.f32 %v449_v25, 0.0  ;;  %v1252_v28 = vpop.f32.mrb[6].mxu0  ;;  %1466 = vmatpush3.bf16.msra.mxu1 %v1429_v57 }
  0xf8   : > { %v464_v29 = vadd.f32 %v1252_v28, %v1776_v9  ;;  %v458_v30 = vpop.f32.mrb[7].mxu0  ;;  %1459 = vmatprep.subr.bf16.mxu1 %v1433_v60 }
  0xf9   : > { %v459_v31 = vadd.f32 %v1776_v9, %v458_v30  ;;  %1303 = vmatprep.mubr.f32.mxu1 %v511_v27 }
  0xfa   : > { %v514_v32 = vmax.f32 %v464_v29, 0.0  ;;  %1304 = vmatmul.mubr.f32.gmra.mrb[4].mxu1 %v512_v26 }
  0xfb   : > { %v513_v33 = vmax.f32 %v459_v31, 0.0  ;;  %v1255_v34 = vpop.f32.mrb[8].mxu0  ;;  %1467 = vmatpush3.bf16.msra.mxu1 %v1433_v60  ;;  %v1453_v60 = vpack.c.bf16 %v722_v59, %v721_v58 }
  0xfc   : > { %v474_v35 = vadd.f32 %v1255_v34, %v1776_v9  ;;  %v468_v36 = vpop.f32.mrb[9].mxu0  ;;  %1460 = vmatprep.subr.bf16.mxu1 %v1739_v63 }
  0xfd   : > { %v469_v37 = vadd.f32 %v1776_v9, %v468_v36  ;;  %1306 = vmatprep.mubr.f32.mxu1 %v513_v33  ;;  %1454 = vmatprep.subr.bf16.mxu0 %v1453_v60 }
  0xfe   : > { %v516_v38 = vmax.f32 %v474_v35, 0.0  ;;  %1307 = vmatmul.mubr.f32.gmra.mrb[6].mxu1 %v514_v32  ;;  %1456 = vmatpush3.bf16.msra.mxu0 %v1453_v60 }
  0xff   : > { %v515_v39 = vmax.f32 %v469_v37, 0.0  ;;  %v1258_v40 = vpop.f32.mrb[10].mxu0  ;;  %1468 = vmatpush3.bf16.msra.mxu1 %v1739_v63 }
 0x100   : > { %v484_v41 = vadd.f32 %v1258_v40, %v1776_v9  ;;  %v478_v42 = vpop.f32.mrb[11].mxu0  ;;  %1461 = vmatprep.subr.bf16.mxu1 %v1748_v2 }
 0x101   : > { %v479_v43 = vadd.f32 %v1776_v9, %v478_v42  ;;  %1309 = vmatprep.mubr.f32.mxu1 %v515_v39 }
 0x102   : > { %v518_v44 = vmax.f32 %v484_v41, 0.0  ;;  %1310 = vmatmul.mubr.f32.gmra.mrb[8].mxu1 %v516_v38 }
 0x103   : > { %v517_v45 = vmax.f32 %v479_v43, 0.0  ;;  %v1261_v46 = vpop.f32.mrb[12].mxu0  ;;  %1469 = vmatpush3.bf16.msra.mxu1 %v1748_v2 }
 0x104   : > { %v494_v47 = vadd.f32 %v1261_v46, %v1776_v9  ;;  %v488_v48 = vpop.f32.mrb[13].mxu0  ;;  %1462 = vmatprep.subr.bf16.mxu1 %v1758_v5  ;;  %v1134_v46 = vld [vmem:[%s1926_s6] ss:$0 sm:$0xff] }
 0x105   : > { %v489_v49 = vadd.f32 %v1776_v9, %v488_v48  ;;  %1312 = vmatprep.mubr.f32.mxu1 %v517_v45 }
 0x106   : > { %v520_v50 = vmax.f32 %v494_v47, 0.0  ;;  %1313 = vmatmul.mubr.f32.gmra.mrb[10].mxu1 %v518_v44 }
 0x107   : > { %v519_v51 = vmax.f32 %v489_v49, 0.0  ;;  %v1264_v52 = vpop.f32.mrb[14].mxu0  ;;  %1470 = vmatpush3.bf16.msra.mxu1 %v1758_v5 }
 0x108   : > { %v504_v53 = vadd.f32 %v1264_v52, %v1776_v9  ;;  %v498_v54 = vpop.f32.mrb[15].mxu0  ;;  %1463 = vmatprep.subr.bf16.mxu1 %v1768_v8 }
 0x109   : > { %v499_v55 = vadd.f32 %v1776_v9, %v498_v54  ;;  %1315 = vmatprep.mubr.f32.mxu1 %v519_v51 }
 0x10a   : > { %v522_v56 = vmax.f32 %v504_v53, 0.0  ;;  %1316 = vmatmul.mubr.f32.gmra.mrb[12].mxu1 %v520_v50 }
 0x10b   : > { %v521_v57 = vmax.f32 %v499_v55, 0.0  ;;  %1471 = vmatpush3.bf16.msra.mxu1 %v1768_v8 }
 0x10c   : > { %1464 = vmatprep.subr.bf16.mxu1 %v1453_v60 }
 0x10d   : > { %1318 = vmatprep.mubr.f32.mxu1 %v521_v57 }
 0x10e   : > { %1319 = vmatmul.mubr.f32.gmra.mrb[14].mxu1 %v522_v56 }
 0x10f   : > { %1472 = vmatpush3.bf16.msra.mxu1 %v1453_v60 }
 0x1c5   : > { %v1299_v62 = vpop.f32.mrb[0].mxu1 }
 0x1c6   : > { %v618_v63 = vadd.f32 %v1299_v62, %v1133_v61  ;;  %v612_v0 = vpop.f32.mrb[1].mxu1 }
 0x1c7   : > { %v613_v1 = vadd.f32 %v1133_v61, %v612_v0 }
 0x1c8   : > { %v692_v4 = vmax.f32 %v618_v63, 0.0 }
 0x1c9   : > { %v691_v2 = vmax.f32 %v613_v1, 0.0  ;;  %v1302_v3 = vpop.f32.mrb[2].mxu1 }
 0x1ca   : > { %v628_v5 = vadd.f32 %v1302_v3, %v1133_v61  ;;  %v622_v6 = vpop.f32.mrb[3].mxu1 }
 0x1cb   : > { %v623_v7 = vadd.f32 %v1133_v61, %v622_v6  ;;  %1353 = vmatprep.mubr.f32.mxu0 %v691_v2 }
 0x1cc   : > { %1354 = vmatmul.mubr.f32.vlgmr.msra.gmra.mrb[16].mxu0 %v692_v4  ;;  %v694_v10 = vmax.f32 %v628_v5, 0.0 }
 0x1cd   : > { %v693_v8 = vmax.f32 %v623_v7, 0.0  ;;  %v1305_v9 = vpop.f32.mrb[4].mxu1 }
 0x1ce   : > { %v638_v11 = vadd.f32 %v1305_v9, %v1133_v61  ;;  %v632_v12 = vpop.f32.mrb[5].mxu1 }
 0x1cf   : > { %v633_v13 = vadd.f32 %v1133_v61, %v632_v12  ;;  %1356 = vmatprep.mubr.f32.mxu0 %v693_v8 }
 0x1d0   : > { %v696_v14 = vmax.f32 %v638_v11, 0.0  ;;  %1357 = vmatmul.mubr.f32.gmra.mrb[18].mxu0 %v694_v10 }
 0x1d1   : > { %v695_v15 = vmax.f32 %v633_v13, 0.0  ;;  %v1308_v16 = vpop.f32.mrb[6].mxu1 }
 0x1d2   : > { %v648_v17 = vadd.f32 %v1308_v16, %v1133_v61  ;;  %v642_v18 = vpop.f32.mrb[7].mxu1 }
 0x1d3   : > { %v643_v19 = vadd.f32 %v1133_v61, %v642_v18  ;;  %1359 = vmatprep.mubr.f32.mxu0 %v695_v15 }
 0x1d4   : > { %v698_v20 = vmax.f32 %v648_v17, 0.0  ;;  %1360 = vmatmul.mubr.f32.gmra.mrb[20].mxu0 %v696_v14 }
 0x1d5   : > { %v697_v21 = vmax.f32 %v643_v19, 0.0  ;;  %v1311_v22 = vpop.f32.mrb[8].mxu1 }
 0x1d6   : > { %v658_v23 = vadd.f32 %v1311_v22, %v1133_v61  ;;  %v652_v24 = vpop.f32.mrb[9].mxu1 }
 0x1d7   : > { %v653_v25 = vadd.f32 %v1133_v61, %v652_v24  ;;  %1362 = vmatprep.mubr.f32.mxu0 %v697_v21 }
 0x1d8   : > { %v700_v26 = vmax.f32 %v658_v23, 0.0  ;;  %1363 = vmatmul.mubr.f32.gmra.mrb[22].mxu0 %v698_v20 }
 0x1d9   : > { %v699_v27 = vmax.f32 %v653_v25, 0.0  ;;  %v1314_v28 = vpop.f32.mrb[10].mxu1 }
 0x1da   : > { %v668_v29 = vadd.f32 %v1314_v28, %v1133_v61  ;;  %v662_v30 = vpop.f32.mrb[11].mxu1 }
 0x1db   : > { %v663_v31 = vadd.f32 %v1133_v61, %v662_v30  ;;  %1365 = vmatprep.mubr.f32.mxu0 %v699_v27 }
 0x1dc   : > { %v702_v32 = vmax.f32 %v668_v29, 0.0  ;;  %1366 = vmatmul.mubr.f32.gmra.mrb[24].mxu0 %v700_v26 }
 0x1dd   : > { %v701_v33 = vmax.f32 %v663_v31, 0.0  ;;  %v1317_v34 = vpop.f32.mrb[12].mxu1 }
 0x1de   : > { %v678_v35 = vadd.f32 %v1317_v34, %v1133_v61  ;;  %v672_v36 = vpop.f32.mrb[13].mxu1 }
 0x1df   : > { %v673_v37 = vadd.f32 %v1133_v61, %v672_v36  ;;  %1368 = vmatprep.mubr.f32.mxu0 %v701_v33 }
 0x1e0   : > { %v704_v38 = vmax.f32 %v678_v35, 0.0  ;;  %1369 = vmatmul.mubr.f32.gmra.mrb[26].mxu0 %v702_v32 }
 0x1e1   : > { %v703_v39 = vmax.f32 %v673_v37, 0.0  ;;  %v1320_v40 = vpop.f32.mrb[14].mxu1 }
 0x1e2   : > { %v688_v41 = vadd.f32 %v1320_v40, %v1133_v61  ;;  %v682_v42 = vpop.f32.mrb[15].mxu1 }
 0x1e3   : > { %v683_v43 = vadd.f32 %v1133_v61, %v682_v42  ;;  %1371 = vmatprep.mubr.f32.mxu1 %v703_v39 }
 0x1e4   : > { %v706_v44 = vmax.f32 %v688_v41, 0.0  ;;  %1372 = vmatmul.mubr.f32.vlgmr.msra.gmra.mrb[16].mxu1 %v704_v38 }
 0x1e5   : > { %v705_v45 = vmax.f32 %v683_v43, 0.0 }
 0x1e7   : > { %1374 = vmatprep.mubr.f32.mxu1 %v705_v45 }
 0x1e8   : > { %1375 = vmatmul.mubr.f32.gmra.mrb[18].mxu1 %v706_v44 }
 0x29f   : > { %v1355_v47 = vpop.f32.mrb[16].mxu0 }
 0x2a0   : > { %v802_v48 = vadd.f32 %v1355_v47, %v1134_v46  ;;  %v796_v49 = vpop.f32.mrb[17].mxu0 }
 0x2a1   : > { %v797_v51 = vadd.f32 %v1134_v46, %v796_v49 }
 0x2a2   : > { %877 = vmax.xlane.f32.xlu0 %v802_v48 }
 0x2a3   : > { %v1358_v50 = vpop.f32.mrb[18].mxu0 }
 0x2a4   : > { %v812_v52 = vadd.f32 %v1358_v50, %v1134_v46  ;;  %v806_v53 = vpop.f32.mrb[19].mxu0 }
 0x2a5   : > { %v807_v55 = vadd.f32 %v1134_v46, %v806_v53 }
 0x2a6   : > { %881 = vmax.xlane.f32.xlu1 %v812_v52  ;;  %875 = vmax.xlane.f32.xlu0 %v797_v51 }
 0x2a7   : > { %v1361_v54 = vpop.f32.mrb[20].mxu0 }
 0x2a8   : > { %v816_v56 = vpop.f32.mrb[21].mxu0  ;;  %v822_v59 = vadd.f32 %v1361_v54, %v1134_v46 }
 0x2a9   : > { %v817_v57 = vadd.f32 %v1134_v46, %v816_v56 }
 0x2aa   : > { %879 = vmax.xlane.f32.xlu1 %v807_v55 }
 0x2ab   : > { %v1364_v58 = vpop.f32.mrb[22].mxu0  ;;  %883 = vmax.xlane.f32.xlu0 %v817_v57 }
 0x2ac   : > { %v826_v60 = vpop.f32.mrb[23].mxu0  ;;  %v832_v63 = vadd.f32 %v1364_v58, %v1134_v46 }
 0x2ad   : > { %v827_v61 = vadd.f32 %v1134_v46, %v826_v60 }
 0x2ae   : > { %885 = vmax.xlane.f32.xlu1 %v822_v59 }
 0x2af   : > { %v1367_v62 = vpop.f32.mrb[24].mxu0  ;;  %887 = vmax.xlane.f32.xlu0 %v827_v61 }
 0x2b0   : > { %v836_v0 = vpop.f32.mrb[25].mxu0  ;;  %v842_v3 = vadd.f32 %v1367_v62, %v1134_v46 }
 0x2b1   : > { %v837_v1 = vadd.f32 %v1134_v46, %v836_v0 }
 0x2b2   : > { %889 = vmax.xlane.f32.xlu1 %v832_v63 }
 0x2b3   : > { %v1370_v2 = vpop.f32.mrb[26].mxu0  ;;  %891 = vmax.xlane.f32.xlu0 %v837_v1 }
 0x2b4   : > { %v846_v4 = vpop.f32.mrb[27].mxu0  ;;  %v852_v7 = vadd.f32 %v1370_v2, %v1134_v46 }
 0x2b5   : > { %v847_v5 = vadd.f32 %v1134_v46, %v846_v4 }
 0x2b6   : > { %893 = vmax.xlane.f32.xlu1 %v842_v3 }
 0x2b7   : > { %v1373_v6 = vpop.f32.mrb[16].mxu1  ;;  %895 = vmax.xlane.f32.xlu0 %v847_v5 }
 0x2b8   : > { %v856_v8 = vpop.f32.mrb[17].mxu1  ;;  %v1817_v11 = vadd.f32 %v1373_v6, %v1134_v46 }
 0x2b9   : > { %v1814_v9 = vadd.f32 %v1134_v46, %v856_v8 }
 0x2ba   : > { %897 = vmax.xlane.f32.xlu1 %v852_v7 }
 0x2bb   : > { %v1376_v10 = vpop.f32.mrb[18].mxu1  ;;  %899 = vmax.xlane.f32.xlu0 %v1814_v9 }
 0x2bc   : > { %v866_v12 = vpop.f32.mrb[19].mxu1  ;;  %v1823_v14 = vadd.f32 %v1376_v10, %v1134_v46 }
 0x2bd   : > { %v1819_v13 = vadd.f32 %v1134_v46, %v866_v12 }
 0x2be   : > { %901 = vmax.xlane.f32.xlu1 %v1817_v11 }
 0x2bf   : > { %903 = vmax.xlane.f32.xlu0 %v1819_v13 }
 0x2c2   : > { %905 = vmax.xlane.f32.xlu1 %v1823_v14 }
 0x32f   : > { %v878_v15 = vpop.xlane.xlu0 %877 }
 0x330   : > { %v1826_v16 = vsub.f32 %v802_v48, %v878_v15 }
 0x332   : > { %v925_v17 = vmul.f32 1.442695, %v1826_v16 }
 0x333   : > { %v882_v18 = vpop.xlane.xlu1 %881  ;;  %v876_v19 = vpop.xlane.xlu0 %875 }
 0x334   : > { %1481 = vpow2.f32 %v925_v17  ;;  %v1829_v20 = vsub.f32 %v812_v52, %v882_v18  ;;  %v1831_v21 = vsub.f32 %v797_v51, %v876_v19 }
 0x336   : > { %v929_v22 = vmul.f32 1.442695, %v1829_v20  ;;  %v923_v23 = vmul.f32 1.442695, %v1831_v21 }
 0x337   : > { %v880_v24 = vpop.xlane.xlu1 %879 }
 0x338   : > { %1483 = vpow2.f32 %v929_v22  ;;  %v1835_v25 = vsub.f32 %v807_v55, %v880_v24  ;;  %v884_v26 = vpop.xlane.xlu0 %883 }
 0x339   : > { %1485 = vpow2.f32 %v923_v23  ;;  %v1837_v27 = vsub.f32 %v817_v57, %v884_v26 }
 0x33a   : > { %v927_v28 = vmul.f32 1.442695, %v1835_v25 }
 0x33b   : > { %v886_v29 = vpop.xlane.xlu1 %885  ;;  %v931_v32 = vmul.f32 1.442695, %v1837_v27 }
 0x33c   : > { %1487 = vpow2.f32 %v927_v28  ;;  %v1840_v30 = vsub.f32 %v822_v59, %v886_v29  ;;  %v888_v31 = vpop.xlane.xlu0 %887 }
 0x33d   : > { %v1843_v33 = vsub.f32 %v827_v61, %v888_v31 }
 0x33e   : > { %v1482_v34 = vpop.eup %1481  ;;  %v933_v35 = vmul.f32 1.442695, %v1840_v30 }
 0x33f   : > { %957 = vadd.xlane.f32.xlu1 %v1482_v34  ;;  %v890_v36 = vpop.xlane.xlu1 %889  ;;  %v935_v39 = vmul.f32 1.442695, %v1843_v33 }
 0x340   : > { %1489 = vpow2.f32 %v933_v35  ;;  %v1846_v37 = vsub.f32 %v832_v63, %v890_v36  ;;  %v892_v38 = vpop.xlane.xlu0 %891 }
 0x341   : > { %1491 = vpow2.f32 %v931_v32  ;;  %v1849_v40 = vsub.f32 %v837_v1, %v892_v38 }
 0x342   : > { %v1484_v41 = vpop.eup %1483  ;;  %v937_v42 = vmul.f32 1.442695, %v1846_v37 }
 0x343   : > { %v1486_v43 = vpop.eup %1485  ;;  %961 = vadd.xlane.f32.xlu1 %v1484_v41  ;;  %v894_v44 = vpop.xlane.xlu1 %893  ;;  %v939_v47 = vmul.f32 1.442695, %v1849_v40 }
 0x344   : > { %1493 = vpow2.f32 %v937_v42  ;;  %v1852_v45 = vsub.f32 %v842_v3, %v894_v44  ;;  %955 = vadd.xlane.f32.xlu0 %v1486_v43  ;;  %v896_v46 = vpop.xlane.xlu0 %895 }
 0x345   : > { %1495 = vpow2.f32 %v935_v39  ;;  %v1855_v48 = vsub.f32 %v847_v5, %v896_v46 }
 0x346   : > { %v1488_v49 = vpop.eup %1487  ;;  %v941_v50 = vmul.f32 1.442695, %v1852_v45 }
 0x347   : > { %v898_v51 = vpop.xlane.xlu1 %897  ;;  %v943_v54 = vmul.f32 1.442695, %v1855_v48 }
 0x348   : > { %1497 = vpow2.f32 %v941_v50  ;;  %v1858_v52 = vsub.f32 %v852_v7, %v898_v51  ;;  %959 = vadd.xlane.f32.xlu0 %v1488_v49  ;;  %v900_v53 = vpop.xlane.xlu0 %899 }
 0x349   : > { %1499 = vpow2.f32 %v939_v47  ;;  %v1862_v55 = vsub.f32 %v1814_v9, %v900_v53 }
 0x34a   : > { %v1490_v56 = vpop.eup %1489  ;;  %v945_v57 = vmul.f32 1.442695, %v1858_v52 }
 0x34b   : > { %v1492_v58 = vpop.eup %1491  ;;  %965 = vadd.xlane.f32.xlu1 %v1490_v56  ;;  %v902_v59 = vpop.xlane.xlu1 %901  ;;  %v947_v62 = vmul.f32 1.442695, %v1862_v55 }
 0x34c   : > { %1501 = vpow2.f32 %v945_v57  ;;  %v1866_v60 = vsub.f32 %v1817_v11, %v902_v59  ;;  %963 = vadd.xlane.f32.xlu0 %v1492_v58  ;;  %v904_v61 = vpop.xlane.xlu0 %903 }
 0x34d   : > { %1503 = vpow2.f32 %v943_v54  ;;  %v1870_v63 = vsub.f32 %v1819_v13, %v904_v61 }
 0x34e   : > { %v1494_v0 = vpop.eup %1493  ;;  %v949_v1 = vmul.f32 1.442695, %v1866_v60 }
 0x34f   : > { %v1496_v2 = vpop.eup %1495  ;;  %969 = vadd.xlane.f32.xlu1 %v1494_v0  ;;  %v906_v3 = vpop.xlane.xlu1 %905  ;;  %v951_v5 = vmul.f32 1.442695, %v1870_v63 }
 0x350   : > { %1505 = vpow2.f32 %v949_v1  ;;  %v1874_v4 = vsub.f32 %v1823_v14, %v906_v3  ;;  %967 = vadd.xlane.f32.xlu0 %v1496_v2 }
 0x351   : > { %1507 = vpow2.f32 %v947_v62 }
 0x352   : > { %v1498_v6 = vpop.eup %1497  ;;  %v953_v7 = vmul.f32 1.442695, %v1874_v4 }
 0x353   : > { %v1500_v8 = vpop.eup %1499  ;;  %973 = vadd.xlane.f32.xlu1 %v1498_v6 }
 0x354   : > { %1509 = vpow2.f32 %v953_v7  ;;  %971 = vadd.xlane.f32.xlu0 %v1500_v8 }
 0x355   : > { %1511 = vpow2.f32 %v951_v5 }
 0x356   : > { %v1502_v9 = vpop.eup %1501 }
 0x357   : > { %v1504_v10 = vpop.eup %1503  ;;  %977 = vadd.xlane.f32.xlu1 %v1502_v9 }
 0x358   : > { %975 = vadd.xlane.f32.xlu0 %v1504_v10 }
 0x35a   : > { %v1506_v11 = vpop.eup %1505 }
 0x35b   : > { %v1508_v12 = vpop.eup %1507  ;;  %981 = vadd.xlane.f32.xlu1 %v1506_v11 }
 0x35c   : > { %979 = vadd.xlane.f32.xlu0 %v1508_v12 }
 0x35e   : > { %v1510_v13 = vpop.eup %1509 }
 0x35f   : > { %v1512_v14 = vpop.eup %1511  ;;  %985 = vadd.xlane.f32.xlu1 %v1510_v13 }
 0x360   : > { %983 = vadd.xlane.f32.xlu0 %v1512_v14 }
 0x3cc   : > { %v958_v15 = vpop.xlane.xlu1 %957 }
 0x3cd   : > { %1513 = vlog2.f32 %v958_v15 }
 0x3d0   : > { %v962_v17 = vpop.xlane.xlu1 %961 }
 0x3d1   : > { %1515 = vlog2.f32 %v962_v17  ;;  %v956_v18 = vpop.xlane.xlu0 %955 }
 0x3d2   : > { %1517 = vlog2.f32 %v956_v18 }
 0x3d5   : > { %v960_v19 = vpop.xlane.xlu0 %959 }
 0x3d6   : > { %1519 = vlog2.f32 %v960_v19 }
 0x3d7   : > { %v1514_v22 = vpop.eup %1513 }
 0x3d8   : > { %v990_v23 = vmul.f32 0.6931472, %v1514_v22  ;;  %v966_v24 = vpop.xlane.xlu1 %965 }
 0x3d9   : > { %1521 = vlog2.f32 %v966_v24  ;;  %v964_v26 = vpop.xlane.xlu0 %963 }
 0x3da   : > { %v1020_v28 = vsub.f32 %v1826_v16, %v990_v23  ;;  %1523 = vlog2.f32 %v964_v26 }
 0x3db   : > { %v1516_v29 = vpop.eup %1515 }
 0x3dc   : > { %v1518_v31 = vpop.eup %1517  ;;  %1036 = vst [vmem:[%s1883_s16 + $0x8] sm:$0xff] %v1020_v28  ;;  %v994_v32 = vmul.f32 0.6931472, %v1516_v29  ;;  %v970_v34 = vpop.xlane.xlu1 %969 }
 0x3dd   : > { %v988_v35 = vmul.f32 0.6931472, %v1518_v31  ;;  %1525 = vlog2.f32 %v970_v34  ;;  %v968_v36 = vpop.xlane.xlu0 %967 }
 0x3de   : > { %v1022_v38 = vsub.f32 %v1829_v20, %v994_v32  ;;  %1527 = vlog2.f32 %v968_v36 }
 0x3df   : > { %v1019_v39 = vsub.f32 %v1831_v21, %v988_v35 }
 0x3e0   : > { %v1520_v41 = vpop.eup %1519  ;;  %1038 = vst [vmem:[%s1883_s16 + $0x18] sm:$0xff] %v1022_v38  ;;  %v974_v42 = vpop.xlane.xlu1 %973 }
 0x3e1   : > { %1035 = vst [vmem:[%s1883_s16] sm:$0xff] %v1019_v39  ;;  %v992_v16 = vmul.f32 0.6931472, %v1520_v41  ;;  %1529 = vlog2.f32 %v974_v42  ;;  %v972_v43 = vpop.xlane.xlu0 %971 }
 0x3e2   : > { %1531 = vlog2.f32 %v972_v43 }
 0x3e3   : > { %v1522_v44 = vpop.eup %1521  ;;  %v1021_v46 = vsub.f32 %v1835_v25, %v992_v16 }
 0x3e4   : > { %v1524_v47 = vpop.eup %1523  ;;  %v998_v49 = vmul.f32 0.6931472, %v1522_v44  ;;  %v978_v20 = vpop.xlane.xlu1 %977 }
 0x3e5   : > { %1037 = vst [vmem:[%s1883_s16 + $0x10] sm:$0xff] %v1021_v46  ;;  %v996_v50 = vmul.f32 0.6931472, %v1524_v47  ;;  %1533 = vlog2.f32 %v978_v20  ;;  %v976_v21 = vpop.xlane.xlu0 %975 }
 0x3e6   : > { %v1024_v51 = vsub.f32 %v1840_v30, %v998_v49  ;;  %1535 = vlog2.f32 %v976_v21 }
 0x3e7   : > { %v1526_v53 = vpop.eup %1525  ;;  %v1023_v54 = vsub.f32 %v1837_v27, %v996_v50 }
 0x3e8   : > { %v1528_v56 = vpop.eup %1527  ;;  %1040 = vst [vmem:[%s1883_s16 + $0x28] sm:$0xff] %v1024_v51  ;;  %v1002_v57 = vmul.f32 0.6931472, %v1526_v53  ;;  %v982_v25 = vpop.xlane.xlu1 %981 }
 0x3e9   : > { %1039 = vst [vmem:[%s1883_s16 + $0x20] sm:$0xff] %v1023_v54  ;;  %v1000_v58 = vmul.f32 0.6931472, %v1528_v56  ;;  %1537 = vlog2.f32 %v982_v25  ;;  %v980_v59 = vpop.xlane.xlu0 %979 }
 0x3ea   : > { %v1026_v61 = vsub.f32 %v1846_v37, %v1002_v57  ;;  %1539 = vlog2.f32 %v980_v59 }
 0x3eb   : > { %v1530_v62 = vpop.eup %1529  ;;  %v1025_v30 = vsub.f32 %v1843_v33, %v1000_v58 }
 0x3ec   : > { %v1532_v0 = vpop.eup %1531  ;;  %1042 = vst [vmem:[%s1883_s16 + $0x38] sm:$0xff] %v1026_v61  ;;  %v1006_v27 = vmul.f32 0.6931472, %v1530_v62  ;;  %v986_v1 = vpop.xlane.xlu1 %985 }
 0x3ed   : > { %1041 = vst [vmem:[%s1883_s16 + $0x30] sm:$0xff] %v1025_v30  ;;  %v1004_v2 = vmul.f32 0.6931472, %v1532_v0  ;;  %1541 = vlog2.f32 %v986_v1  ;;  %v984_v3 = vpop.xlane.xlu0 %983 }
 0x3ee   : > { %v1028_v5 = vsub.f32 %v1852_v45, %v1006_v27  ;;  %1543 = vlog2.f32 %v984_v3 }
 0x3ef   : > { %v1534_v37 = vpop.eup %1533  ;;  %v1027_v6 = vsub.f32 %v1849_v40, %v1004_v2 }
 0x3f0   : > { %v1536_v7 = vpop.eup %1535  ;;  %1044 = vst [vmem:[%s1883_s16 + $0x48] sm:$0xff] %v1028_v5  ;;  %v1010_v33 = vmul.f32 0.6931472, %v1534_v37 }
 0x3f1   : > { %1043 = vst [vmem:[%s1883_s16 + $0x40] sm:$0xff] %v1027_v6  ;;  %v1008_v8 = vmul.f32 0.6931472, %v1536_v7 }
 0x3f2   : > { %v1030_v9 = vsub.f32 %v1858_v52, %v1010_v33 }
 0x3f3   : > { %v1538_v10 = vpop.eup %1537  ;;  %v1029_v11 = vsub.f32 %v1855_v48, %v1008_v8 }
 0x3f4   : > { %v1540_v12 = vpop.eup %1539  ;;  %1046 = vst [vmem:[%s1883_s16 + $0x58] sm:$0xff] %v1030_v9  ;;  %v1014_v45 = vmul.f32 0.6931472, %v1538_v10 }
 0x3f5   : > { %1045 = vst [vmem:[%s1883_s16 + $0x50] sm:$0xff] %v1029_v11  ;;  %v1012_v13 = vmul.f32 0.6931472, %v1540_v12 }
 0x3f6   : > { %v1032_v40 = vsub.f32 %v1866_v60, %v1014_v45 }
 0x3f7   : > { %v1542_v14 = vpop.eup %1541  ;;  %v1031_v15 = vsub.f32 %v1862_v55, %v1012_v13 }
 0x3f8   : > { %v1544_v17 = vpop.eup %1543  ;;  %1048 = vst [vmem:[%s1883_s16 + $0x68] sm:$0xff] %v1032_v40  ;;  %v1018_v18 = vmul.f32 0.6931472, %v1542_v14 }
 0x3f9   : > { %1047 = vst [vmem:[%s1883_s16 + $0x60] sm:$0xff] %v1031_v15  ;;  %v1016_v52 = vmul.f32 0.6931472, %v1544_v17 }
 0x3fa   : > { %v1034_v19 = vsub.f32 %v1874_v4, %v1018_v18 }
 0x3fb   : > { %v1033_v48 = vsub.f32 %v1870_v63, %v1016_v52 }
 0x3fc   : > { %1050 = vst [vmem:[%s1883_s16 + $0x78] sm:$0xff] %v1034_v19 }
 0x3fd   : > { %1049 = vst [vmem:[%s1883_s16 + $0x70] sm:$0xff] %v1033_v48 }
 0x3fe PF: > { %s17_s24 = sadd.s32 1, %s1551_s24  }
 0x3ff   : > { %p14_p4 = scmp.ge.s32.totalorder %s17_s24, 4  }
 0x401   :  { %16 = sbr.rel (!%p14_p4) target bundleno = 1 (0x1), region = 78 }

</bundles_post_ra>
